<compile_context>
chip_gen: v7x
topology: tpu7x:2x2x1
jax: 0.10.0
libtpu: 0.0.40
codegen_flags: <defaults>
</compile_context>

<pallas_src>
import functools

import jax
import jax.numpy as jnp
from jax.experimental import pallas as pl
from jax.experimental.pallas import tpu as pltpu


# ---------------------------------------------------------------------------
# helpers
# ---------------------------------------------------------------------------
def _round_up(n, m):
    return ((n + m - 1) // m) * m


def _packing_layout(input_features, output_features):
    """Static layout of the packed weight/bias buffer (nested tuples -> hashable).

    Weights sit side-by-side along the lane axis, biases follow as single
    columns.  wspecs[i] = (row0, col0, out_dim, in_dim); bspecs[i] = (row0, col0, out_dim).
    """
    dims = ((5, input_features), (4, 5), (3, 4), (output_features, 3))
    wspecs, col = [], 0
    for (o, i) in dims:
        wspecs.append((0, col, o, i))
        col += i
    bspecs = []
    for (o, _) in dims:
        bspecs.append((0, col, o))
        col += 1
    rows = _round_up(max(o for o, _ in dims), 8)
    cols = _round_up(col, 128)
    return (dims, tuple(wspecs), tuple(bspecs), rows, cols)


def _pack_params(params, layout):
    """Pack the 4 weights + 4 biases (PyTorch [out, in] layout) into one block."""
    _, wspecs, bspecs, rows, cols = layout
    buf = jnp.zeros((rows, cols), jnp.float32)
    for li, (r, c, o, i) in enumerate(wspecs, start=1):
        buf = buf.at[r:r + o, c:c + i].set(params[f"w{li}"].astype(jnp.float32))
    for li, (r, c, o) in enumerate(bspecs, start=1):
        buf = buf.at[r:r + o, c:c + 1].set(
            params[f"b{li}"].reshape(o, 1).astype(jnp.float32))
    return buf


def build_model(params):
    """Pack parameters ONCE (outside the per-call path). Returns (packed, layout)."""
    in_f = params["w1"].shape[1]
    out_f = params["w4"].shape[0]
    layout = _packing_layout(in_f, out_f)
    return _pack_params(params, layout), layout


def default_act_dtype():
    """bf16 activations where the EUP/VPU have a bf16 path (v6e/v7x), else f32."""
    try:
        kind = jax.devices()[0].device_kind.lower()
    except Exception:
        return jnp.float32
    if any(tag in kind for tag in ("v6", "v7", "tpu7", "7x")):
        return jnp.bfloat16
    return jnp.float32          # v5e and older: no bf16 VPU/EUP path


def _pick_tile(b_pad, batch_tile):
    """Batch-tile (lane) size: multiple of 512, VMEM-safe, >=2 steps when possible."""
    bt = max(512, _round_up(batch_tile, 512))
    # ~0.22 KB/lane footprint -> 32768 lanes ~ 7 MiB, under every generation's
    # scoped-VMEM default (v5e: 16 MiB).  Cap here instead of raising the limit.
    bt = min(bt, 32768)
    if b_pad > 512:
        # Cap at ~half the batch so the "parallel" grid axis has >=2 steps and
        # both v7x TensorCores get work.
        bt = min(bt, _round_up(pl.cdiv(b_pad, 2), 512))
    return min(bt, b_pad)


# ---------------------------------------------------------------------------
# kernel
# ---------------------------------------------------------------------------
def _mlp_kernel(p_ref, x_ref, o_ref, *, wspecs, bspecs, act_dtype):
    # x_ref: (F, B_tile)  -- batch on the lane axis
    # p_ref: (8, 128) f32 packed weights + biases (static ref slices are free)
    # o_ref: (out_features, B_tile) f32  -- lane-dense stores
    n_layers = len(wspecs)
    h = x_ref[...].astype(act_dtype)
    for li in range(n_layers):                       # statically unrolled
        r, c, o, i = wspecs[li]
        br, bc, bo = bspecs[li]
        w = p_ref[r:r + o, c:c + i].astype(act_dtype)   # (o, i)
        b = p_ref[br:br + bo, bc:bc + 1]                # (o, 1) f32
        z = jnp.dot(w, h, preferred_element_type=jnp.float32) + b
        if li < n_layers - 1:
            h = jnp.tanh(z.astype(act_dtype))        # bf16 tanh on v6e/v7x
        else:
            h = jax.nn.sigmoid(z)                    # final layer kept in f32
    o_ref[...] = h.astype(o_ref.dtype)


# ---------------------------------------------------------------------------
# forward implementations
# ---------------------------------------------------------------------------
def _forward_fm(x_fm, packed, layout, batch_tile, act_dtype):
    """Core path: x_fm is feature-major [F, B]; returns [out_features, B] f32."""
    dims, wspecs, bspecs, rows, cols = layout
    F, B = x_fm.shape
    out_f = dims[-1][0]

    # Pad only to the next multiple of 512 (<=511 wasted columns, O(1) cost),
    # NOT to a full tile; partial edge blocks handle the remainder.
    b_pad = _round_up(max(B, 512), 512)
    if b_pad != B:
        x_fm = jnp.pad(x_fm, ((0, 0), (0, b_pad - B)))

    tile = _pick_tile(b_pad, batch_tile)
    grid = (pl.cdiv(b_pad, tile),)

    flops = 2 * b_pad * sum(o * i for o, i in dims)
    transcendentals = b_pad * sum(o for o, _ in dims)
    bytes_accessed = (x_fm.size * x_fm.dtype.itemsize
                      + rows * cols * 4
                      + b_pad * out_f * 4)

    kernel = functools.partial(
        _mlp_kernel, wspecs=wspecs, bspecs=bspecs, act_dtype=act_dtype)

    yT = pl.pallas_call(
        kernel,
        out_shape=jax.ShapeDtypeStruct((out_f, b_pad), jnp.float32),
        grid_spec=pl.GridSpec(
            grid=grid,
            in_specs=[
                pl.BlockSpec((rows, cols), lambda i: (0, 0)),   # packed params
                pl.BlockSpec((F, tile), lambda i: (0, i)),      # x tile
            ],
            out_specs=pl.BlockSpec((out_f, tile), lambda i: (0, i)),
        ),
        compiler_params=pltpu.CompilerParams(
            dimension_semantics=("parallel",)),                 # megacore on v7x
        cost_estimate=pl.CostEstimate(
            flops=flops,
            transcendentals=transcendentals,
            bytes_accessed=bytes_accessed),
    )(packed, x_fm)

    return yT if b_pad == B else yT[:, :B]


@functools.partial(jax.jit, static_argnames=("layout", "batch_tile", "act_dtype"))
def mlp_forward_fm(x_fm, packed, layout, *, batch_tile=32768, act_dtype=jnp.float32):
    """Feature-major API: x_fm [F, B] -> [out_features, B].  No relayout passes."""
    return _forward_fm(x_fm, packed, layout, batch_tile, act_dtype)


@functools.partial(jax.jit, static_argnames=("layout", "batch_tile", "act_dtype"))
def mlp_forward(x, packed, layout, *, batch_tile=32768, act_dtype=jnp.float32):
    """Batch-major convenience API: x [B, F] -> [B, out_features].

    NOTE: the two transposes here are separate (un-hidden) relayout passes over
    x/y; for HBM-bound large-batch use prefer `mlp_forward_fm`.
    """
    return _forward_fm(x.T, packed, layout, batch_tile, act_dtype).T


# ---------------------------------------------------------------------------
# params + reference (PyTorch-equivalent semantics)
# ---------------------------------------------------------------------------
def init_params(key, input_features, output_features):
    """nn.Linear-style init; weights kept in PyTorch-native [out, in] layout."""
    dims = [(5, input_features), (4, 5), (3, 4), (output_features, 3)]
    params = {}
    for idx, (fan_out, fan_in) in enumerate(dims, start=1):
        key, kw, kb = jax.random.split(key, 3)
        bound = 1.0 / (fan_in ** 0.5)
        params[f"w{idx}"] = jax.random.uniform(
            kw, (fan_out, fan_in), jnp.float32, -bound, bound)
        params[f"b{idx}"] = jax.random.uniform(
            kb, (fan_out,), jnp.float32, -bound, bound)
    return params


def reference_forward(x, p):
    h = jnp.tanh(x @ p["w1"].T + p["b1"])
    h = jnp.tanh(h @ p["w2"].T + p["b2"])
    h = jnp.tanh(h @ p["w3"].T + p["b3"])
    return jax.nn.sigmoid(h @ p["w4"].T + p["b4"])


# ---------------------------------------------------------------------------
if __name__ == "__main__":
    key = jax.random.PRNGKey(0)
    input_features = 8     # diabetes dataset: 8 predictor features
    output_features = 1
    batch = 50             # NOT a multiple of 8/128/512 -> exercises edge handling

    key, kx, kp = jax.random.split(key, 3)
    x = jax.random.normal(kx, (batch, input_features), jnp.float32)
    params = init_params(kp, input_features, output_features)

    packed, layout = build_model(params)          # pack once, reuse every call
    ref = reference_forward(x, params)

    # f32-activation path: exact vs JAX reference.
    out = jax.block_until_ready(
        mlp_forward(x, packed, layout, act_dtype=jnp.float32))
    assert out.shape == (batch, output_features)
    assert jnp.allclose(out, ref, atol=1e-5, rtol=1e-5), "f32 mismatch vs reference"

    # Feature-major path (skips both wrapper transposes).
    out_fm = jax.block_until_ready(
        mlp_forward_fm(x.T, packed, layout, act_dtype=jnp.float32))
    assert out_fm.shape == (output_features, batch)
    assert jnp.allclose(out_fm.T, ref, atol=1e-5, rtol=1e-5), "fm-path mismatch"

    # Auto-selected activation dtype: bf16 on v6e/v7x (EUP/MXU bf16), f32 on v5e.
    act = default_act_dtype()
    out_auto = jax.block_until_ready(
        mlp_forward(x, packed, layout, act_dtype=act))
    tol = 1e-5 if act == jnp.float32 else 5e-2    # bf16 tanh chain drifts slightly
    assert out_auto.shape == (batch, output_features)
    assert jnp.allclose(out_auto, ref, atol=tol, rtol=tol), "auto-dtype mismatch"

    print("KERNEL_OK")
</pallas_src>

<mosaic_0001>
module attributes {stable_mosaic.version = 11 : i64} {
  func.func @_mlp_kernel(%arg0: i32, %arg1: memref<8x128xf32, #tpu.memory_space<vmem>>, %arg2: memref<8x512xf32, #tpu.memory_space<vmem>>, %arg3: memref<1x512xf32, #tpu.memory_space<vmem>>) attributes {dimension_semantics = [#tpu.dimension_semantics<parallel>], iteration_bounds = array<i64: 1>, scalar_prefetch = 0 : i64, scratch_operands = 0 : i64, tpu.core_type = #tpu.core_type<tc>, window_params = [{pipeline_mode = #tpu.pipeline_mode<synchronous>, transform_indices = @transform_0, window_bounds = array<i64: 8, 128>}, {transform_indices = @transform_1, window_bounds = array<i64: 8, 512>}, {transform_indices = @transform_2, window_bounds = array<i64: 1, 512>}]} {
    %c0 = arith.constant 0 : index
    %c0_0 = arith.constant 0 : index
    %0 = vector.load %arg2[%c0, %c0_0] : memref<8x512xf32, #tpu.memory_space<vmem>>, vector<8x512xf32>
    %c0_1 = arith.constant 0 : index
    %c0_2 = arith.constant 0 : index
    %1 = vector.load %arg1[%c0_1, %c0_2] : memref<8x128xf32, #tpu.memory_space<vmem>>, vector<5x8xf32>
    %c0_3 = arith.constant 0 : index
    %c20 = arith.constant 20 : index
    %2 = vector.load %arg1[%c0_3, %c20] : memref<8x128xf32, #tpu.memory_space<vmem>>, vector<5x1xf32>
    %cst = arith.constant dense<0.000000e+00> : vector<5x512xf32>
    %3 = tpu.matmul %1, %0, %cst {dimension_numbers = #tpu.dot_dimension_numbers<[1], [0], [0], [1], [0, 0, 1, 1], [], []>} : vector<5x8xf32>, vector<8x512xf32>, vector<5x512xf32> -> vector<5x512xf32>
    %4 = vector.broadcast %2 : vector<5x1xf32> to vector<5x512xf32>
    %5 = arith.addf %3, %4 : vector<5x512xf32>
    %6 = math.tanh %5 : vector<5x512xf32>
    %c0_4 = arith.constant 0 : index
    %c8 = arith.constant 8 : index
    %7 = vector.load %arg1[%c0_4, %c8] : memref<8x128xf32, #tpu.memory_space<vmem>>, vector<4x5xf32>
    %c0_5 = arith.constant 0 : index
    %c21 = arith.constant 21 : index
    %8 = vector.load %arg1[%c0_5, %c21] : memref<8x128xf32, #tpu.memory_space<vmem>>, vector<4x1xf32>
    %cst_6 = arith.constant dense<0.000000e+00> : vector<4x512xf32>
    %9 = tpu.matmul %7, %6, %cst_6 {dimension_numbers = #tpu.dot_dimension_numbers<[1], [0], [0], [1], [0, 0, 1, 1], [], []>} : vector<4x5xf32>, vector<5x512xf32>, vector<4x512xf32> -> vector<4x512xf32>
    %10 = vector.broadcast %8 : vector<4x1xf32> to vector<4x512xf32>
    %11 = arith.addf %9, %10 : vector<4x512xf32>
    %12 = math.tanh %11 : vector<4x512xf32>
    %c0_7 = arith.constant 0 : index
    %c13 = arith.constant 13 : index
    %13 = vector.load %arg1[%c0_7, %c13] : memref<8x128xf32, #tpu.memory_space<vmem>>, vector<3x4xf32>
    %c0_8 = arith.constant 0 : index
    %c22 = arith.constant 22 : index
    %14 = vector.load %arg1[%c0_8, %c22] : memref<8x128xf32, #tpu.memory_space<vmem>>, vector<3x1xf32>
    %cst_9 = arith.constant dense<0.000000e+00> : vector<3x512xf32>
    %15 = tpu.matmul %13, %12, %cst_9 {dimension_numbers = #tpu.dot_dimension_numbers<[1], [0], [0], [1], [0, 0, 1, 1], [], []>} : vector<3x4xf32>, vector<4x512xf32>, vector<3x512xf32> -> vector<3x512xf32>
    %16 = vector.broadcast %14 : vector<3x1xf32> to vector<3x512xf32>
    %17 = arith.addf %15, %16 : vector<3x512xf32>
    %18 = math.tanh %17 : vector<3x512xf32>
    %c0_10 = arith.constant 0 : index
    %c17 = arith.constant 17 : index
    %19 = vector.load %arg1[%c0_10, %c17] : memref<8x128xf32, #tpu.memory_space<vmem>>, vector<1x3xf32>
    %c0_11 = arith.constant 0 : index
    %c23 = arith.constant 23 : index
    %20 = vector.load %arg1[%c0_11, %c23] : memref<8x128xf32, #tpu.memory_space<vmem>>, vector<1x1xf32>
    %cst_12 = arith.constant dense<0.000000e+00> : vector<1x512xf32>
    %21 = tpu.matmul %19, %18, %cst_12 {dimension_numbers = #tpu.dot_dimension_numbers<[1], [0], [0], [1], [0, 0, 1, 1], [], []>} : vector<1x3xf32>, vector<3x512xf32>, vector<1x512xf32> -> vector<1x512xf32>
    %22 = vector.broadcast %20 : vector<1x1xf32> to vector<1x512xf32>
    %23 = arith.addf %21, %22 : vector<1x512xf32>
    %24 = arith.negf %23 : vector<1x512xf32>
    %25 = math.exp %24 : vector<1x512xf32>
    %cst_13 = arith.constant 1.000000e+00 : f32
    %26 = vector.broadcast %cst_13 : f32 to vector<1x512xf32>
    %27 = arith.addf %26, %25 : vector<1x512xf32>
    %28 = arith.divf %26, %27 : vector<1x512xf32>
    %c0_14 = arith.constant 0 : index
    %c0_15 = arith.constant 0 : index
    %29 = vector.load %arg3[%c0_14, %c0_15] : memref<1x512xf32, #tpu.memory_space<vmem>>, vector<1x512xf32>
    tpu.vector_store %arg3[%c0_14, %c0_15], %28 {strides = array<i32>} : memref<1x512xf32, #tpu.memory_space<vmem>>, vector<1x512xf32>,
    return
  }
  func.func @transform_0(%arg0: i32) -> (i32, i32) {
    %c0_i32 = arith.constant 0 : i32
    %c0_i32_0 = arith.constant 0 : i32
    %c0_i32_1 = arith.constant 0 : i32
    return %c0_i32, %c0_i32_0 : i32, i32
  }
  func.func @transform_1(%arg0: i32) -> (i32, i32) {
    %c0_i32 = arith.constant 0 : i32
    %c0_i32_0 = arith.constant 0 : i32
    return %c0_i32, %arg0 : i32, i32
  }
  func.func @transform_2(%arg0: i32) -> (i32, i32) {
    %c0_i32 = arith.constant 0 : i32
    %c0_i32_0 = arith.constant 0 : i32
    return %c0_i32, %arg0 : i32, i32
  }
}

</mosaic_0001>

<bundles_post_ra>
// kernel: mlp_forward.1
= control target key start
LH: loop header
LB: loop body
LE: loop exit
PB: predicated region body
PF: predicated region fallthrough
CT: control target
= control target key end

     0   :  { %v816_v3 = vmov 0.0   ;;  %vm21_vm0 = vcmask 64512   ;;  %v817_v6 = vmov 20   ;;  %v819_v8 = vmov 21   ;;  %s820_s23 = smov 115   ;;  %s822_s26 = smov 111   ;;  %s875_s1 = inlined_call_operand.vmem [shape: f32[8,512], index: 1, kind: input, shape index: {}]   ;;  %s876_s0 = inlined_call_operand.vmem [shape: f32[8,128], index: 0, kind: input, shape index: {}]   ;;  %s877_s2 = inlined_call_operand.vmem [shape: f32[1,512], index: 2, kind: output, shape index: {}]  }
   0x1   :  { %v12_v0 = vld [vmem:[%s875_s1 + $0x8] sm:$0xff]  ;;  %v14_v1 = vld [vmem:[%s875_s1 + $0x18] sm:$0xff]  ;;  %v11_v2 = vld [vmem:[%s875_s1] sm:$0xff]  ;;  %88 = vmatprep.mubr.f32.mxu0 %v816_v3  ;;  %159 = vmatprep.mubr.f32.mxu1 %v816_v3  ;;  %vm181_vm1 = vcmask 1044480   ;;  %vm178_vm2 = vcmask 39936   ;;  %v821_v25 = vmov 22  }
   0x2   :  { %24 = vmatprep.subr.mxu0 %v12_v0  ;;  %95 = vmatprep.subr.mxu1 %v14_v1  ;;  %v13_v4 = vld [vmem:[%s875_s1 + $0x10] sm:$0xff]  ;;  %v15_v5 = vld [vmem:[%s876_s0] sm:$0x1f]  ;;  %s818_s1 = smov 120   ;;  %vm351_vm3 = vcmask 1043456   ;;  %vm348_vm4 = vcmask 31744  }
   0x3   :  { %25 = vmatpush1.msra.mxu0 %v11_v2  ;;  %96 = vmatpush1.msra.mxu1 %v13_v4  ;;  %v170_v7 = vld [vmem:[%s876_s0] sm:$0xf]  ;;  %v823_v40 = vmov 23   ;;  %vm521_vm5 = vcmask 1042432   ;;  %vm518_vm6 = vcmask 23552  }
   0x4   :  { %738 = vmatmul.mubr.msk.f32.vlgmr.msra.gmra.mrb[0].mxu0 %vm21_vm0, %v15_v5  ;;  %739 = vmatmul.mubr.msk.f32.vlgmr.msra.gmra.mrb[0].mxu1 %vm21_vm0, %v15_v5  ;;  %v340_v9 = vld [vmem:[%s876_s0] sm:$0x7] }
   0x5   :  { %771 = vset.pattern.permute.xlu0 %v817_v6  ;;  %258 = vmatprep.mubr.f32.mxu0 %v816_v3  ;;  %v510_v24 = vld [vmem:[%s876_s0] sm:$0x1] }
   0x6   :  { %18 = vperm.xlu0 %771, %v15_v5   ;;  %329 = vmatprep.mubr.f32.mxu1 %v816_v3 }
   0x7   :  { %772 = vset.pattern.permute.xlu1 %v819_v8 }
   0x8   :  { %173 = vperm.xlu1 %772, %v170_v7  }
   0xa   :  { %176 = vrot.lane.b32.xlu0 %v170_v7, %s818_s1 }
   0xb   :  { %773 = vset.pattern.permute.xlu0 %v821_v25 }
   0xc   :  { %346 = vrot.lane.b32.xlu1 %v340_v9, %s820_s23 }
   0xd   :  { %774 = vset.pattern.permute.xlu1 %v823_v40 }
   0xe   :  { %343 = vperm.xlu0 %773, %v340_v9  }
  0x10   :  { %516 = vrot.lane.b32.xlu1 %v510_v24, %s822_s26 }
  0x12   :  { %775 = vset.pattern.permute.xlu0 %v823_v40 }
  0x14   :  { %513 = vperm.xlu1 %774, %v510_v24  }
  0x85   :  { %v19_v10 = vpop.permute.xlu0 %18 }
  0x87   :  { %v174_v26 = vpop.permute.xlu1 %173 }
  0x89   :  { %v177_v21 = vpop.permute.xlu0 %176 }
  0x8b   :  { %v347_v37 = vpop.permute.xlu1 %346 }
  0x8d   :  { %v344_v41 = vpop.permute.xlu0 %343 }
  0x8f   :  { %v517_v52 = vpop.permute.xlu1 %516 }
  0x93   :  { %v514_v55 = vpop.permute.xlu1 %513 }
  0xd7   :  { %v90_v11 = vpop.f32.mrb[0].mxu0  ;;  %v161_v12 = vpop.f32.mrb[0].mxu1 }
  0xd8   :  { %v91_v13 = vadd.f32 %v90_v11, %v19_v10  ;;  %v92_v14 = vpop.f32.mrb[1].mxu0  ;;  %v163_v15 = vpop.f32.mrb[1].mxu1  ;;  %v162_v18 = vadd.f32 %v161_v12, %v19_v10  ;;  %v824_v12 = vmov 1966171168  }
  0xd9   :  { %v93_v16 = vadd.f32 %v92_v14, %v19_v10  ;;  %v164_v17 = vadd.f32 %v163_v15, %v19_v10  ;;  %v709_v14 = vlaneseq }
  0xda   :  { %776 = vtanh.f32 %v91_v13  ;;  %v707_v13 = vunpack.c.l.s4 %v824_v12 }
  0xdb   :  { %778 = vtanh.f32 %v93_v16  ;;  %v710_v16 = vshrl.u32 %v709_v14, 7  ;;  %vm731_vm7 = vcmp.lt.s32.totalorder %v709_v14, 512 }
  0xdc   :  { %780 = vtanh.f32 %v164_v17  ;;  %v708_v15 = vunpack.c.0.s8 %v707_v13 }
  0xdd   :  { %782 = vtanh.f32 %v162_v18 }
  0xe4   :  { %v777_v19 = vpop.eup %776 }
  0xe5   :  { %v779_v20 = vpop.eup %778 }
  0xe6   :  { %v781_v22 = vpop.eup %780  ;;  %740 = vmatprep.subr.msk.mxu0 %vm181_vm1, %v779_v20 }
  0xe7   :  { %v783_v23 = vpop.eup %782  ;;  %743 = vmatprep.subr.msk.mxu1 %vm181_vm1, %v781_v22  ;;  %741 = vmatpush1.msk.msra.mxu0 %vm181_vm1, %v777_v19  ;;  %v711_v19 = vsub.s32 %v708_v15, %v710_v16 }
  0xe8   :  { %744 = vmatpush1.msk.msra.mxu1 %vm181_vm1, %v783_v23  ;;  %742 = vmatmul.mubr.msk.f32.vlgmr.msra.gmra.mrb[2].mxu0 %vm178_vm2, %v177_v21 }
  0xe9   :  { %745 = vmatmul.mubr.msk.f32.vlgmr.msra.gmra.mrb[2].mxu1 %vm178_vm2, %v177_v21  ;;  %428 = vmatprep.mubr.f32.mxu0 %v816_v3 }
  0xea   :  { %499 = vmatprep.mubr.f32.mxu1 %v816_v3 }
 0x1bb   :  { %v260_v27 = vpop.f32.mrb[2].mxu0 }
 0x1bc   :  { %v261_v28 = vadd.f32 %v260_v27, %v174_v26  ;;  %v331_v29 = vpop.f32.mrb[2].mxu1  ;;  %v262_v30 = vpop.f32.mrb[3].mxu0 }
 0x1bd   :  { %v263_v31 = vadd.f32 %v262_v30, %v174_v26  ;;  %v333_v32 = vpop.f32.mrb[3].mxu1  ;;  %v332_v33 = vadd.f32 %v331_v29, %v174_v26 }
 0x1be   :  { %v334_v34 = vadd.f32 %v333_v32, %v174_v26  ;;  %784 = vtanh.f32 %v261_v28 }
 0x1bf   :  { %786 = vtanh.f32 %v263_v31 }
 0x1c0   :  { %788 = vtanh.f32 %v334_v34 }
 0x1c1   :  { %790 = vtanh.f32 %v332_v33 }
 0x1c8   :  { %v785_v35 = vpop.eup %784 }
 0x1c9   :  { %v787_v36 = vpop.eup %786 }
 0x1ca   :  { %v789_v38 = vpop.eup %788  ;;  %746 = vmatprep.subr.msk.mxu0 %vm351_vm3, %v787_v36 }
 0x1cb   :  { %v791_v39 = vpop.eup %790  ;;  %749 = vmatprep.subr.msk.mxu1 %vm351_vm3, %v789_v38  ;;  %747 = vmatpush1.msk.msra.mxu0 %vm351_vm3, %v785_v35 }
 0x1cc   :  { %750 = vmatpush1.msk.msra.mxu1 %vm351_vm3, %v791_v39  ;;  %748 = vmatmul.mubr.msk.f32.vlgmr.msra.gmra.mrb[4].mxu0 %vm348_vm4, %v347_v37 }
 0x1cd   :  { %751 = vmatmul.mubr.msk.f32.vlgmr.msra.gmra.mrb[4].mxu1 %vm348_vm4, %v347_v37  ;;  %598 = vmatprep.mubr.f32.mxu0 %v816_v3 }
 0x1ce   :  { %669 = vmatprep.mubr.f32.mxu1 %v816_v3 }
 0x29f   :  { %v430_v42 = vpop.f32.mrb[4].mxu0 }
 0x2a0   :  { %v431_v43 = vadd.f32 %v430_v42, %v344_v41  ;;  %v501_v44 = vpop.f32.mrb[4].mxu1  ;;  %v432_v45 = vpop.f32.mrb[5].mxu0 }
 0x2a1   :  { %v433_v46 = vadd.f32 %v432_v45, %v344_v41  ;;  %v503_v47 = vpop.f32.mrb[5].mxu1  ;;  %v502_v48 = vadd.f32 %v501_v44, %v344_v41 }
 0x2a2   :  { %v504_v49 = vadd.f32 %v503_v47, %v344_v41  ;;  %792 = vtanh.f32 %v431_v43 }
 0x2a3   :  { %794 = vtanh.f32 %v433_v46 }
 0x2a4   :  { %796 = vtanh.f32 %v504_v49 }
 0x2a5   :  { %798 = vtanh.f32 %v502_v48 }
 0x2ac   :  { %v793_v50 = vpop.eup %792 }
 0x2ad   :  { %v795_v51 = vpop.eup %794 }
 0x2ae   :  { %v797_v53 = vpop.eup %796  ;;  %752 = vmatprep.subr.msk.mxu0 %vm521_vm5, %v795_v51 }
 0x2af   :  { %v799_v54 = vpop.eup %798  ;;  %755 = vmatprep.subr.msk.mxu1 %vm521_vm5, %v797_v53  ;;  %753 = vmatpush1.msk.msra.mxu0 %vm521_vm5, %v793_v50 }
 0x2b0   :  { %756 = vmatpush1.msk.msra.mxu1 %vm521_vm5, %v799_v54  ;;  %754 = vmatmul.mubr.msk.f32.vlgmr.msra.gmra.mrb[6].mxu0 %vm518_vm6, %v517_v52 }
 0x2b1   :  { %757 = vmatmul.mubr.msk.f32.vlgmr.msra.gmra.mrb[6].mxu1 %vm518_vm6, %v517_v52 }
 0x383   :  { %v600_v56 = vpop.f32.mrb[6].mxu0 }
 0x384   :  { %v671_v57 = vpop.f32.mrb[6].mxu1  ;;  %v601_v58 = vadd.f32 %v600_v56, %v514_v55  ;;  %v602_v59 = vpop.f32.mrb[7].mxu0 }
 0x385   :  { %v672_v60 = vadd.f32 %v671_v57, %v514_v55  ;;  %v603_v61 = vadd.f32 %v602_v59, %v514_v55  ;;  %v673_v62 = vpop.f32.mrb[7].mxu1 }
 0x386   :  { %v758_v63 = vmul.f32 -1.442695, %v601_v58  ;;  %v674_v0 = vadd.f32 %v673_v62, %v514_v55 }
 0x387   :  { %v760_v1 = vmul.f32 -1.442695, %v672_v60  ;;  %v759_v2 = vmul.f32 -1.442695, %v603_v61 }
 0x388   :  { %800 = vpow2.f32 %v758_v63  ;;  %v761_v3 = vmul.f32 -1.442695, %v674_v0 }
 0x389   :  { %802 = vpow2.f32 %v760_v1 }
 0x38a   :  { %804 = vpow2.f32 %v759_v2 }
 0x38b   :  { %806 = vpow2.f32 %v761_v3 }
 0x392   :  { %v801_v4 = vpop.eup %800 }
 0x393   :  { %v803_v5 = vpop.eup %802  ;;  %v688_v6 = vadd.f32 1.0, %v801_v4 }
 0x394   :  { %v805_v7 = vpop.eup %804  ;;  %v690_v8 = vadd.f32 1.0, %v803_v5 }
 0x395   :  { %v807_v9 = vpop.eup %806  ;;  %808 = vrcp.f32 %v688_v6  ;;  %v689_v10 = vadd.f32 1.0, %v805_v7 }
 0x396   :  { %810 = vrcp.f32 %v690_v8  ;;  %v691_v11 = vadd.f32 1.0, %v807_v9 }
 0x397   :  { %812 = vrcp.f32 %v689_v10 }
 0x398   :  { %814 = vrcp.f32 %v691_v11 }
 0x39f   :  { %v809_v17 = vpop.eup %808 }
 0x3a0   :  { %v811_v18 = vpop.eup %810 }
 0x3a1   :  { %v813_v20 = vpop.eup %812 }
 0x3a2   :  { %v815_v21 = vpop.eup %814  ;;  %v704_v22 = vcombine.low %v809_v17, %v813_v20 }
 0x3a3   :  { %v705_v23 = vcombine.low %v811_v18, %v815_v21 }
 0x3a4   :  { %v712_v24 = vrot.slane %v704_v22, %v711_v19 }
 0x3a5   :  { %v719_v25 = vrot.slane %v705_v23, %v711_v19 }
 0x3a7   :  { %v720_v26 = vcombine.low %v712_v24, %v719_v25 }
 0x3a9   :  { %v727_v27 = vrot.slane %v720_v26, %v711_v19 }
 0x3ab   :  { %733 = vst.msk [vmem:[%s877_s2] sm:$0xf] %vm731_vm7, %v727_v27 }

</bundles_post_ra>
